<compile_context>
chip_gen: v6e
topology: v6e:2x2x1
jax: 0.10.0
libtpu: 0.0.40
codegen_flags: <defaults>
</compile_context>

<pallas_src>
import jax
import jax.numpy as jnp
from jax.experimental import pallas as pl
from jax.experimental.pallas import tpu as pltpu


def cat_fusion_kernel(fb_ref, fw_ref, w_ref, b_ref, out_ref):
    # fb_ref/fw_ref: (C, T) f32,  w_ref: (C, 2C) bf16,  b_ref: (C, 1) f32
    x = jnp.concatenate([fb_ref[...], fw_ref[...]], axis=0)      # (2C, T) f32
    acc = jnp.dot(w_ref[...], x.astype(jnp.bfloat16),            # MXU, K = 2C
                  preferred_element_type=jnp.float32)            # (C, T) f32
    out_ref[...] = acc + b_ref[...]                              # bias per row


def _pick_spatial_tile(hw, max_tile=2048):
    """Largest spatial tile that divides H*W; multiple of 128 when tiling."""
    if hw <= max_tile:
        return hw
    for t in range(max_tile - max_tile % 128, 0, -128):
        if hw % t == 0:
            return t
    return hw  # fallback: full spatial extent (last dim == full array dim)


def cat_fusion_pallas(f_b_nchw, f_w_nchw, w, b):
    """f_b, f_w: (N, C, H, W) f32; w: (C, 2C) f32; b: (C,) f32 -> (N, C, H, W)."""
    N, C, H, W = f_b_nchw.shape
    HW = H * W
    THW = _pick_spatial_tile(HW)

    fb = f_b_nchw.reshape(N, C, HW)          # contiguous reshape, no transpose
    fw = f_w_nchw.reshape(N, C, HW)
    w_bf16 = w.astype(jnp.bfloat16)          # fold the cast into the wrapper
    b_col = b.reshape(C, 1)

    img_spec = pl.BlockSpec((None, C, THW), lambda n, s: (n, 0, s))

    out = pl.pallas_call(
        cat_fusion_kernel,
        out_shape=jax.ShapeDtypeStruct((N, C, HW), jnp.float32),
        grid_spec=pltpu.PrefetchScalarGridSpec(
            num_scalar_prefetch=0,
            grid=(N, HW // THW),
            in_specs=[
                img_spec,                                   # f_b  (C, THW)
                img_spec,                                   # f_w  (C, THW)
                pl.BlockSpec((C, 2 * C), lambda n, s: (0, 0)),  # W (resident)
                pl.BlockSpec((C, 1), lambda n, s: (0, 0)),      # bias
            ],
            out_specs=pl.BlockSpec((None, C, THW), lambda n, s: (n, 0, s)),
        ),
        compiler_params=pltpu.CompilerParams(
            dimension_semantics=("parallel", "parallel")),
    )(fb, fw, w_bf16, b_col)
    return out.reshape(N, C, H, W)


def cat_fusion_reference(f_b_nchw, f_w_nchw, w, b):
    """Pure-JAX (f32) reference of CatFusion.forward."""
    x = jnp.concatenate([f_b_nchw, f_w_nchw], axis=1)           # (N, 2C, H, W)
    out = jnp.einsum("oc,nchw->nohw", w, x)                     # 1x1 conv
    return out + b[None, :, None, None]


if __name__ == "__main__":
    # Small shapes consistent with the module (in_channels scaled down).
    N, C, H, W = 2, 32, 16, 16
    key = jax.random.PRNGKey(0)
    k_b, k_w, k_wt, k_bias = jax.random.split(key, 4)
    f_b = jax.random.normal(k_b, (N, C, H, W), jnp.float32)     # NCHW, like torch
    f_w = jax.random.normal(k_w, (N, C, H, W), jnp.float32)
    # Conv2d(2C, C, 1) weight (C_out, C_in) and bias, deterministic init.
    w = jax.random.normal(k_wt, (C, 2 * C), jnp.float32) / jnp.sqrt(2.0 * C)
    b = 0.1 * jax.random.normal(k_bias, (C,), jnp.float32)

    out = jax.block_until_ready(cat_fusion_pallas(f_b, f_w, w, b))
    ref = jax.block_until_ready(cat_fusion_reference(f_b, f_w, w, b))

    assert out.shape == (N, C, H, W)
    # bf16 MXU operands with f32 accumulation -> rounding-level differences only.
    assert jnp.allclose(out, ref, atol=2e-2, rtol=2e-2), "mismatch vs reference"
    print("KERNEL_OK")
</pallas_src>

<mosaic_0001>
module attributes {stable_mosaic.version = 11 : i64} {
  func.func @cat_fusion_kernel(%arg0: i32, %arg1: i32, %arg2: memref<1x32x256xf32, #tpu.memory_space<vmem>>, %arg3: memref<1x32x256xf32, #tpu.memory_space<vmem>>, %arg4: memref<32x64xbf16, #tpu.memory_space<vmem>>, %arg5: memref<32x1xf32, #tpu.memory_space<vmem>>, %arg6: memref<1x32x256xf32, #tpu.memory_space<vmem>>) attributes {dimension_semantics = [#tpu.dimension_semantics<parallel>, #tpu.dimension_semantics<parallel>], iteration_bounds = array<i64: 2, 1>, scalar_prefetch = 0 : i64, scratch_operands = 0 : i64, tpu.core_type = #tpu.core_type<tc>, window_params = [{transform_indices = @transform_0, window_bounds = array<i64: 1, 32, 256>}, {transform_indices = @transform_1, window_bounds = array<i64: 1, 32, 256>}, {pipeline_mode = #tpu.pipeline_mode<synchronous>, transform_indices = @transform_2, window_bounds = array<i64: 32, 64>}, {pipeline_mode = #tpu.pipeline_mode<synchronous>, transform_indices = @transform_3, window_bounds = array<i64: 32, 1>}, {transform_indices = @transform_4, window_bounds = array<i64: 1, 32, 256>}]} {
    %c0 = arith.constant 0 : index
    %c0_0 = arith.constant 0 : index
    %c0_1 = arith.constant 0 : index
    %0 = vector.load %arg2[%c0, %c0_0, %c0_1] : memref<1x32x256xf32, #tpu.memory_space<vmem>>, vector<1x32x256xf32>
    %1 = vector.shape_cast %0 : vector<1x32x256xf32> to vector<32x256xf32>
    %c0_2 = arith.constant 0 : index
    %c0_3 = arith.constant 0 : index
    %c0_4 = arith.constant 0 : index
    %2 = vector.load %arg3[%c0_2, %c0_3, %c0_4] : memref<1x32x256xf32, #tpu.memory_space<vmem>>, vector<1x32x256xf32>
    %3 = vector.shape_cast %2 : vector<1x32x256xf32> to vector<32x256xf32>
    %4 = tpu.concatenate %1, %3 in 0 : vector<32x256xf32>, vector<32x256xf32> -> vector<64x256xf32>
    %c0_5 = arith.constant 0 : index
    %c0_6 = arith.constant 0 : index
    %5 = vector.load %arg4[%c0_5, %c0_6] : memref<32x64xbf16, #tpu.memory_space<vmem>>, vector<32x64xbf16>
    %6 = arith.truncf %4 : vector<64x256xf32> to vector<64x256xbf16>
    %cst = arith.constant dense<0.000000e+00> : vector<32x256xf32>
    %7 = tpu.matmul %5, %6, %cst {dimension_numbers = #tpu.dot_dimension_numbers<[1], [0], [0], [1], [0, 0, 1, 1], [], []>} : vector<32x64xbf16>, vector<64x256xbf16>, vector<32x256xf32> -> vector<32x256xf32>
    %c0_7 = arith.constant 0 : index
    %c0_8 = arith.constant 0 : index
    %8 = vector.load %arg5[%c0_7, %c0_8] : memref<32x1xf32, #tpu.memory_space<vmem>>, vector<32x1xf32>
    %9 = vector.broadcast %8 : vector<32x1xf32> to vector<32x256xf32>
    %10 = arith.addf %7, %9 : vector<32x256xf32>
    %c0_9 = arith.constant 0 : index
    %c0_10 = arith.constant 0 : index
    %c0_11 = arith.constant 0 : index
    %11 = vector.load %arg6[%c0_9, %c0_10, %c0_11] : memref<1x32x256xf32, #tpu.memory_space<vmem>>, vector<1x32x256xf32>
    %12 = vector.shape_cast %11 : vector<1x32x256xf32> to vector<32x256xf32>
    %13 = vector.shape_cast %10 : vector<32x256xf32> to vector<1x32x256xf32>
    tpu.vector_store %arg6[%c0_9, %c0_10, %c0_11], %13 {strides = array<i32>} : memref<1x32x256xf32, #tpu.memory_space<vmem>>, vector<1x32x256xf32>,
    return
  }
  func.func @transform_0(%arg0: i32, %arg1: i32) -> (i32, i32, i32) {
    %c0_i32 = arith.constant 0 : i32
    %c0_i32_0 = arith.constant 0 : i32
    return %arg0, %c0_i32, %arg1 : i32, i32, i32
  }
  func.func @transform_1(%arg0: i32, %arg1: i32) -> (i32, i32, i32) {
    %c0_i32 = arith.constant 0 : i32
    %c0_i32_0 = arith.constant 0 : i32
    return %arg0, %c0_i32, %arg1 : i32, i32, i32
  }
  func.func @transform_2(%arg0: i32, %arg1: i32) -> (i32, i32) {
    %c0_i32 = arith.constant 0 : i32
    %c0_i32_0 = arith.constant 0 : i32
    %c0_i32_1 = arith.constant 0 : i32
    return %c0_i32, %c0_i32_0 : i32, i32
  }
  func.func @transform_3(%arg0: i32, %arg1: i32) -> (i32, i32) {
    %c0_i32 = arith.constant 0 : i32
    %c0_i32_0 = arith.constant 0 : i32
    %c0_i32_1 = arith.constant 0 : i32
    return %c0_i32, %c0_i32_0 : i32, i32
  }
  func.func @transform_4(%arg0: i32, %arg1: i32) -> (i32, i32, i32) {
    %c0_i32 = arith.constant 0 : i32
    %c0_i32_0 = arith.constant 0 : i32
    return %arg0, %c0_i32, %arg1 : i32, i32, i32
  }
}

</mosaic_0001>

<bundles_post_ra>
// kernel: tpu_custom_call.1
= control target key start
LH: loop header
LB: loop body
LE: loop exit
PB: predicated region body
PF: predicated region fallthrough
CT: control target
= control target key end

     0   :  { %s1040_s0 = inlined_call_operand.hbm [shape: f32[2,32,256], index: 0, kind: input, shape index: {}]   ;;  %s1041_s1 = inlined_call_operand.hbm [shape: f32[2,32,256], index: 1, kind: input, shape index: {}]   ;;  %s1042_s2 = inlined_call_operand.vmem [shape: bf16[32,64], index: 2, kind: input, shape index: {}]   ;;  %s1043_s3 = inlined_call_operand.vmem [shape: f32[32,1], index: 3, kind: input, shape index: {}]   ;;  %s1044_s4 = inlined_call_operand.hbm [shape: f32[2,32,256], index: 4, kind: output, shape index: {}]  }
   0x1   :  { %1046 = sst [smem:[#allocation12_spill]] %s1040_s0 }
   0x2   :  { %9 = vsyncpa [#allocation3], 0 }
   0x3   :  { %11 = vsyncpa [#allocation3 + $0x1], 0 }
   0x4   :  { %12 = vsyncpa [#allocation6], 0 }
   0x5   :  { %14 = vsyncpa [#allocation6 + $0x1], 0 }
   0x6   :  { %15 = vsyncpa [#allocation4], 0 }
   0x7   :  { %17 = vsyncpa [#allocation4 + $0x1], 0  ;;  %s826_s15 = smov 0   ;;  %s828_s16 = smov 0  }
   0x8   :  { %s830_s17 = smov 0   ;;  %s832_s18 = smov 0  }
   0x9   :  { %s834_s19 = smov 0   ;;  %s836_s20 = smov 0  }
   0xa LB: > { %s541_s21 = sadd.s32 4294967295, %s791_s20   ;;  %s542_s22 = sadd.s32 4294967294, %s791_s20   ;;  %s791_s20 = sphi %s836_s20, %s23_s20   ;;  %s787_s19 = sphi %s834_s19, %s1060_s19   ;;  %s783_s18 = sphi %s832_s18, %s1059_s18   ;;  %s779_s17 = sphi %s830_s17, %s1058_s17   ;;  %s775_s16 = sphi %s828_s16, %s1057_s16   ;;  %s771_s15 = sphi %s826_s15, %s1056_s15  }
   0xb   : > { %s35_s23 = sadd.s32 1, %s787_s19  ;;  %s44_s24 = sadd.s32 1, %s779_s17 }
   0xc   : > { %p37_p0 = scmp.ge.s32.totalorder %s35_s23, 2  ;;  %p51_p1 = scmp.ne.s32.totalorder %s779_s17, %s775_s16 }
   0xd   : > { %p52_p2 = scmp.eq.s32.totalorder %s791_s20, 0  ;;  %p57_p3 = scmp.ne.s32.totalorder %s775_s16, %s771_s15 }
   0xe   : > { %s1062_s23 = smov (%p37_p0, %s35_s23), 0  ;;  %p58_p5 = scmp.eq.s32.totalorder %s541_s21, 0 }
   0xf   : > { %1047 = sst [smem:[#allocation11_spill]] %s1062_s23  ;;  %p867_p4 = por %p52_p2, %p51_p1 }
  0x10   : > { %s39_s26 = ssub.s32 %s787_s19, %s1062_s23  ;;  %p153_p6 = scmp.eq.s32.totalorder %s541_s21, 1 }
  0x11   : > { %p42_p7 = scmp.eq.s32.totalorder %s39_s26, 0  ;;  %p873_p8 = por %p58_p5, %p57_p3 }
  0x12   : > { %p877_p9 = por %p153_p6, %p51_p1  ;;  %p159_p10 = scmp.eq.s32.totalorder %s542_s22, 1 }
  0x13   : > { %s882_s29 = scalar_select %p42_p7, %s779_s17, %s44_s24  }
  0x14   : > { %p884_p11 = por %p159_p10, %p57_p3  ;;  %p544_p12 = scmp.ge.s32.totalorder %s791_s20, 2 }
  0x15   : > { %p592_p13 = scmp.lt.s32.totalorder %s791_s20, 2  ;;  %s891_s5 = sand.u32 1, %s779_s17  }
  0x16   : > { %s545_s6 = sshll.u32 %s891_s5, 6  ;;  %s564_s7 = sshll.u32 %s787_s19, 10 }
  0x17   : > { %s1052_s0 = sld [smem:[#allocation12_spill]]  ;;  %s189_s11 = scalar_lea.vmem [#allocation2], %s545_s6 }
  0x18   : > { %s198_s12 = sshll.u32 %s189_s11, 4  ;;  %p904_p0 = pnand %p592_p13, %p867_p4  ;;  %s199_s12 = int_to_ptr.vmem [resolvable:$true] %s198_s12 }
  0x19   : > { %p551_p1 = scmp.ge.s32.totalorder %s791_s20, 1  ;;  %s186_s14 = scalar_lea.sflag [#allocation3], %s891_s5 }
  0x1a   : > { %p653_p2 = pneg %p904_p0  ;;  %s664_s21 = scalar_lea.vmem %s199_s12, 1024 }
  0x1b   : > { %p665_p3 = scmp.ne.s32.totalorder %s199_s12, %s664_s21  ;;  %s793_s22 = smov [#allocation2]  }
  0x1c   : > { %s669_s24 = sshll.u32 %s793_s22, 4  ;;  %s670_s24 = int_to_ptr.vmem [resolvable:$false] %s669_s24 }
  0x1d   : > { %s197_s10 = scalar_lea.hbm %s1052_s0, %s564_s7  ;;  %p667_p5 = pnand %p665_p3, %p653_p2 }
  0x1e   : > { %s671_s25 = scalar_lea.vmem %s670_s24, 2048  ;;  %p672_p4 = scmp.lt.s32.totalorder %s199_s12, %s670_s24 }
  0x1f   : > { %p668_p6 = pneg %p667_p5  ;;  %p673_p7 = scmp.lt.s32.totalorder %s671_s25, %s664_s21 }
  0x21   : > { %p674_p10 = por %p673_p7, %p672_p4 }
  0x23   : > { %p675_p13 = pnand %p674_p10, %p668_p6 }
  0x25   : > { %678 = shalt.err (!%p675_p13)
}
  0x26   : > { %s794_s26 = smov 256   ;;  %s795_s8 = smov 16  }
  0x27   : > { %584 = dma.hbm_to_vmem [thread:$0]  (!%p904_p0), %s197_s10, 1024, %s199_s12, %s186_s14, %s794_s26, %s794_s26, %s795_s8  }
  0x28   : > { %p229_p3 = scmp.lt.s32.totalorder %s791_s20, 3  ;;  %s220_s21 = scalar_lea.hbm %s1041_s1, %s564_s7 }
  0x29   : > { %s212_s24 = scalar_lea.vmem [#allocation5], %s545_s6  ;;  %s209_s0 = scalar_lea.sflag [#allocation6], %s891_s5 }
  0x2a   : > { %p925_p5 = pnand %p551_p1, %p229_p3  ;;  %s221_s25 = sshll.u32 %s212_s24, 4  ;;  %s222_s25 = int_to_ptr.vmem [resolvable:$true] %s221_s25 }
  0x2b   : > { %s692_s23 = scalar_lea.vmem %s222_s25, 1024  ;;  %s796_s10 = smov [#allocation5]  }
  0x2c   : > { %p693_p6 = scmp.ne.s32.totalorder %s222_s25, %s692_s23  ;;  %s697_s12 = sshll.u32 %s796_s10, 4  ;;  %s698_s12 = int_to_ptr.vmem [resolvable:$false] %s697_s12 }
  0x2d   : > { %s699_s7 = scalar_lea.vmem %s698_s12, 2048  ;;  %p700_p10 = scmp.lt.s32.totalorder %s222_s25, %s698_s12 }
  0x2e   : > { %p695_p4 = pnand %p693_p6, %p653_p2  ;;  %p701_p1 = scmp.lt.s32.totalorder %s699_s7, %s692_s23 }
  0x30   : > { %p696_p7 = pneg %p695_p4  ;;  %p702_p13 = por %p701_p1, %p700_p10 }
  0x32   : > { %p703_p3 = pnand %p702_p13, %p696_p7 }
  0x34   : > { %706 = shalt.err (!%p703_p3)
}
  0x35   : > { %587 = dma.hbm_to_vmem [thread:$0]  (!%p904_p0), %s220_s21, 1024, %s222_s25, %s209_s0, %s794_s26, %s794_s26, %s795_s8  }
  0x36   : > { %233 = sbr.rel (%p925_p5) target bundleno = 296 (0x128), region = 36  ;;  %s940_s5 = sand.u32 (!%p925_p5), 1, %s775_s16  }
  0x37   : > { %s943_s6 = sshll.u32 (!%p925_p5), %s940_s5, 6  ;;  %s236_s14 = scalar_lea.sflag (!%p925_p5), [#allocation3], %s940_s5 }
  0x38   : > { %s947_s23 = scalar_lea.vmem (!%p925_p5), [#allocation2], %s943_s6 }
  0x3b   : > { %758 = dma.done.wait (%p873_p8), %s236_s14, 1024  }
  0x3c   : > { %760 = vsyncadd (%p873_p8), %s236_s14, 4294966272  ;;  %s245_s0 = scalar_lea.sflag [#allocation6], %s940_s5  ;;  %s248_s13 = scalar_lea.vmem [#allocation5], %s943_s6 }
  0x3d   : > { %762 = dma.done.wait (%p873_p8), %s245_s0, 1024  }
  0x3e   : > { %764 = vsyncadd (%p873_p8), %s245_s0, 4294966272  ;;  %v797_v0 = vmov 0   ;;  %v295_v1 = vld [vmem:[%s248_s13 + $0x28] sm:$0xff]  ;;  %v297_v2 = vld [vmem:[%s248_s13 + $0x38] sm:$0xff]  ;;  %vm344_vm0 = vcmask 523264   ;;  %s277_s14 = scalar_lea.vmem [#allocation7], %s943_s6 }
  0x3f   : > { %383 = vmatprep.mubr.bf16.mxu0 %v797_v0  ;;  %393 = vmatprep.mubr.bf16.mxu1 %v797_v0  ;;  %v294_v3 = vld [vmem:[%s248_s13 + $0x20] sm:$0xff]  ;;  %v309_v4 = vpack.c.bf16 %v297_v2, %v295_v1  ;;  %v296_v5 = vld [vmem:[%s248_s13 + $0x30] sm:$0xff]  ;;  %v291_v6 = vld [vmem:[%s248_s13 + $0x8] sm:$0xff]  ;;  %s566_s0 = sshll.u32 %s783_s18, 10  ;;  %s413_s18 = scalar_lea.sflag [#allocation4], %s940_s5 }
  0x40   : > { %648 = vset.pattern.permute.xlu1 %v797_v0  ;;  %647 = vset.pattern.permute.xlu0 %v797_v0  ;;  %v293_v7 = vld [vmem:[%s248_s13 + $0x18] sm:$0xff]  ;;  %v308_v8 = vpack.c.bf16 %v296_v5, %v294_v3  ;;  %v290_v10 = vld [vmem:[%s248_s13] sm:$0xff]  ;;  %v292_v11 = vld [vmem:[%s248_s13 + $0x10] sm:$0xff]  ;;  %s992_s27 = scalar_lea.hbm %s1044_s4, %s566_s0  ;;  %s798_s8 = smov [#allocation7]  }
  0x41   : > { %v307_v9 = vpack.c.bf16 %v293_v7, %v291_v6  ;;  %v287_v12 = vld [vmem:[%s947_s23 + $0x28] sm:$0xff]  ;;  %359 = vmatprep.subr.bf16.mxu0 %v309_v4  ;;  %567 = vmatprep.subr.bf16.mxu1 %v309_v4  ;;  %v289_v13 = vld [vmem:[%s947_s23 + $0x38] sm:$0xff]  ;;  %v306_v14 = vpack.c.bf16 %v292_v11, %v290_v10  ;;  %v286_v15 = vld [vmem:[%s947_s23 + $0x20] sm:$0xff]  ;;  %s711_s9 = sshll.u32 %s798_s8, 4  ;;  %s712_s9 = int_to_ptr.vmem [resolvable:$false] %s711_s9 }
  0x42   : > { %360 = vmatpush1.bf16.msra.mxu0 %v308_v8  ;;  %571 = vmatpush1.bf16.msra.mxu1 %v308_v8  ;;  %v288_v16 = vld [vmem:[%s947_s23 + $0x30] sm:$0xff]  ;;  %v305_v17 = vpack.c.bf16 %v289_v13, %v287_v12  ;;  %v283_v18 = vld [vmem:[%s947_s23 + $0x8] sm:$0xff]  ;;  %v285_v19 = vld [vmem:[%s947_s23 + $0x18] sm:$0xff]  ;;  %s713_s11 = scalar_lea.vmem %s712_s9, 2048 }
  0x43   : > { %361 = vmatprep.subr.bf16.mxu0 %v307_v9  ;;  %568 = vmatprep.subr.bf16.mxu1 %v307_v9  ;;  %v312_v20 = vld [vmem:[%s1043_s3 + $0x10] sm:$0xff]  ;;  %v310_v21 = vld [vmem:[%s1043_s3] sm:$0xff]  ;;  %v304_v22 = vpack.c.bf16 %v288_v16, %v286_v15  ;;  %v303_v23 = vpack.c.bf16 %v285_v19, %v283_v18  ;;  %v313_v26 = vld [vmem:[%s1043_s3 + $0x18] sm:$0xff] }
  0x44   : > { %v282_v24 = vld [vmem:[%s947_s23] sm:$0xff]  ;;  %v284_v25 = vld [vmem:[%s947_s23 + $0x10] sm:$0xff]  ;;  %326 = vperm.xlu1 %648, %v312_v20   ;;  %316 = vperm.xlu0 %647, %v310_v21   ;;  %v311_v27 = vld [vmem:[%s1043_s3 + $0x8] sm:$0xff]  ;;  %s428_s23 = sshll.u32 %s277_s14, 4  ;;  %s987_s23 = int_to_ptr.vmem [resolvable:$true] %s428_s23 }
  0x45   : > { %v302_v28 = vpack.c.bf16 %v284_v25, %v282_v24  ;;  %v649_v29 = vld [vmem:[%s1042_s2] sm:$0xff]   ;;  %v650_v30 = vld [vmem:[%s1042_s2 + $0x8] sm:$0xff]   ;;  %s707_s26 = scalar_lea.vmem %s987_s23, 1024  ;;  %p714_p5 = scmp.lt.s32.totalorder %s987_s23, %s712_s9 }
  0x46   : > { %362 = vmatpush1.bf16.msra.mxu0 %v306_v14  ;;  %572 = vmatpush1.bf16.msra.mxu1 %v306_v14  ;;  %p708_p8 = scmp.ne.s32.totalorder %s987_s23, %s707_s26  ;;  %p715_p6 = scmp.lt.s32.totalorder %s713_s11, %s707_s26 }
  0x47   : > { %363 = vmatprep.subr.bf16.mxu0 %v305_v17  ;;  %569 = vmatprep.subr.bf16.mxu1 %v305_v17 }
  0x48   : > { %331 = vperm.xlu1 %648, %v313_v26   ;;  %321 = vperm.xlu0 %647, %v311_v27   ;;  %p709_p0 = pnand %p708_p8, %p877_p9  ;;  %p716_p4 = por %p715_p6, %p714_p5 }
  0x4a   : > { %364 = vmatpush1.bf16.msra.mxu0 %v304_v22  ;;  %573 = vmatpush1.bf16.msra.mxu1 %v304_v22  ;;  %p710_p2 = pneg %p709_p0 }
  0x4b   : > { %365 = vmatprep.subr.bf16.mxu0 %v303_v23  ;;  %570 = vmatprep.subr.bf16.mxu1 %v303_v23 }
  0x4c   : > { %p717_p7 = pnand %p716_p4, %p710_p2 }
  0x4e   : > { %366 = vmatpush1.bf16.msra.mxu0 %v302_v28  ;;  %574 = vmatpush1.bf16.msra.mxu1 %v302_v28 }
  0x51   : > { %557 = vmatmul.mubr.msk.bf16.vlgmr.msra.gmra.mxu0 %vm344_vm0, %v649_v29  ;;  %558 = vmatmul.mubr.msk.bf16.vlgmr.msra.gmra.mxu1 %vm344_vm0, %v650_v30 }
  0xbf   : > { %v327_v31 = vpop.permute.xlu1 %326  ;;  %v317_v32 = vpop.permute.xlu0 %316 }
  0xc3   : > { %v332_v39 = vpop.permute.xlu1 %331  ;;  %v322_v40 = vpop.permute.xlu0 %321 }
 0x111   : > { %v385_v33 = vpop.f32.mrf.mxu0  ;;  %v395_v34 = vpop.f32.mrf.mxu1 }
 0x112   : > { %v386_v35 = vadd.f32 %v385_v33, %v317_v32  ;;  %v396_v36 = vadd.f32 %v395_v34, %v327_v31 }
 0x113   : > { %v387_v37 = vpop.f32.mrf.mxu0  ;;  %v397_v38 = vpop.f32.mrf.mxu1 }
 0x114   : > { %404 = vst [vmem:[%s277_s14] sm:$0xff] %v386_v35  ;;  %408 = vst [vmem:[%s277_s14 + $0x20] sm:$0xff] %v396_v36  ;;  %v388_v41 = vadd.f32 %v387_v37, %v317_v32  ;;  %v398_v42 = vadd.f32 %v397_v38, %v327_v31 }
 0x115   : > { %v389_v43 = vpop.f32.mrf.mxu0  ;;  %v399_v44 = vpop.f32.mrf.mxu1 }
 0x116   : > { %405 = vst [vmem:[%s277_s14 + $0x8] sm:$0xff] %v388_v41  ;;  %409 = vst [vmem:[%s277_s14 + $0x28] sm:$0xff] %v398_v42  ;;  %v390_v45 = vadd.f32 %v389_v43, %v322_v40  ;;  %v400_v46 = vadd.f32 %v399_v44, %v332_v39 }
 0x117   : > { %v391_v47 = vpop.f32.mrf.mxu0  ;;  %v401_v48 = vpop.f32.mrf.mxu1 }
 0x118   : > { %406 = vst [vmem:[%s277_s14 + $0x10] sm:$0xff] %v390_v45  ;;  %410 = vst [vmem:[%s277_s14 + $0x30] sm:$0xff] %v400_v46  ;;  %v392_v49 = vadd.f32 %v391_v47, %v322_v40  ;;  %v402_v50 = vadd.f32 %v401_v48, %v332_v39 }
 0x11a   : > { %407 = vst [vmem:[%s277_s14 + $0x18] sm:$0xff] %v392_v49  ;;  %411 = vst [vmem:[%s277_s14 + $0x38] sm:$0xff] %v402_v50 }
 0x11b   : > { %720 = shalt.err (!%p717_p7)
}
 0x11c   : > { %s721_s21 = scalar_lea.hbm %s992_s27, 1024  ;;  %s725_s25 = scalar_lea.hbm %s1044_s4, 2048 }
 0x11d   : > { %p722_p10 = scmp.ne.s32.totalorder %s992_s27, %s721_s21  ;;  %p726_p3 = scmp.lt.s32.totalorder %s992_s27, %s1044_s4 }
 0x11e   : > { %p727_p8 = scmp.lt.s32.totalorder %s725_s25, %s721_s21 }
 0x11f   : > { %p723_p1 = pnand %p722_p10, %p877_p9 }
 0x120   : > { %p728_p0 = por %p727_p8, %p726_p3 }
 0x121   : > { %p724_p13 = pneg %p723_p1 }
 0x123   : > { %p729_p2 = pnand %p728_p0, %p724_p13 }
 0x125   : > { %732 = shalt.err (!%p729_p2)
}
 0x126   : > { %s799_s7 = smov 256   ;;  %s800_s14 = smov 16  }
 0x127   : > { %579 = dma.vmem_to_hbm [thread:$0]  (%p877_p9), %s987_s23, 1024, %s992_s27, %s413_s18, %s799_s7, %s799_s7, %s800_s14  }
 0x128 PF: > { %s443_s0 = sand.u32 1, %s771_s15   ;;  %p589_p5 = pnand %p544_p12, %p884_p11 }
 0x129   : > { %s444_s6 = scalar_lea.sflag [#allocation4], %s443_s0 }
 0x12a   : > { %p590_p6 = pneg %p589_p5 }
 0x12c   : > { %766 = dma.done.wait (%p590_p6), %s444_s6, 1024  }
 0x12d   : > { %768 = vsyncadd (%p590_p6), %s444_s6, 4294966272  ;;  %s23_s20 = sadd.s32 1, %s791_s20   ;;  %s1055_s28 = sld [smem:[#allocation11_spill]] }
 0x12e   : > { %p20_p4 = scmp.ge.s32.totalorder %s23_s20, 4   ;;  %s1056_s15 = smov %s775_s16 }
 0x12f   : > { %s1057_s16 = smov %s779_s17  ;;  %s1058_s17 = smov %s882_s29 }
 0x130   : > { %s1059_s18 = smov %s787_s19  ;;  %22 = sbr.rel (!%p20_p4) target bundleno = 10 (0xa), region = 94 }
 0x133   : > { %s1060_s19 = smov %s1055_s28 }
 0x135   :  { %449 = vsyncpa [#allocation3], 1 }
 0x136   :  { %451 = vsyncpa [#allocation3 + $0x1], 1 }
 0x137   :  { %452 = vsyncpa [#allocation6], 1 }
 0x138   :  { %454 = vsyncpa [#allocation6 + $0x1], 1 }
 0x139   :  { %455 = vsyncpa [#allocation4], 1 }
 0x13a   :  { %457 = vsyncpa [#allocation4 + $0x1], 1 }

</bundles_post_ra>
